<compile_context>
chip_gen: v7x
topology: tpu7x:2x2x1
jax: 0.10.0
libtpu: 0.0.40
codegen_flags: <defaults>
</compile_context>

<pallas_src>
import functools

import jax
import jax.numpy as jnp
from jax.experimental import pallas as pl
from jax.experimental.pallas import tpu as pltpu

LANES = 128
MAX_BLOCK_ROWS = 2048  # (2048,128) f32 block = 1 MiB; 2 in x 2 bufs + 2 acc ~ 6 MiB VMEM


def _sublane_multiple(dtype) -> int:
    # f32 -> 8 sublanes, bf16 -> 16, int8/fp8 -> 32 (packed (8,128) vreg tiling).
    return max(8, 32 // jnp.dtype(dtype).itemsize)


def _round_up(x: int, m: int) -> int:
    return ((x + m - 1) // m) * m


def _iou_kernel(x_ref, t_ref, out_ref, acc_prod_ref, acc_sum_ref, *,
                smooth, n_valid):
    i = pl.program_id(0)
    block_rows = x_ref.shape[0]

    @pl.when(i == 0)
    def _init():
        acc_prod_ref[...] = jnp.zeros_like(acc_prod_ref)
        acc_sum_ref[...] = jnp.zeros_like(acc_sum_ref)

    # Per-element validity mask: handles both the lane padding (if any) and the
    # partial last grid block, with no wrapper-side concatenate.  Mask BEFORE
    # multiply/add: the out-of-range tail of a block may hold garbage / NaN.
    row_ids = jax.lax.broadcasted_iota(jnp.int32, (block_rows, LANES), 0)
    lane_ids = jax.lax.broadcasted_iota(jnp.int32, (block_rows, LANES), 1)
    global_idx = (i * block_rows + row_ids) * LANES + lane_ids
    valid = global_idx < n_valid

    s = jax.nn.sigmoid(x_ref[...].astype(jnp.float32))
    t = t_ref[...].astype(jnp.float32)
    s = jnp.where(valid, s, 0.0)
    t = jnp.where(valid, t, 0.0)

    # Elementwise VMEM vector accumulation (VPU only, no per-step XLU reduce
    # or SMEM scalar RMW); also better f32 accumulation accuracy for large N.
    acc_prod_ref[...] += s * t        # partial intersection (per element)
    acc_sum_ref[...] += s + t         # partial total        (per element)

    @pl.when(i == pl.num_programs(0) - 1)
    def _finalize():
        intersection = jnp.sum(acc_prod_ref[...])
        total = jnp.sum(acc_sum_ref[...])
        union = total - intersection
        iou = (intersection + smooth) / (union + smooth)
        out_ref[0, 0] = 1.0 - iou


def iou_loss(inputs, targets, smooth: int = 1):
    """Pallas TPU implementation of IoULoss.forward."""
    x = jnp.ravel(inputs)
    t = jnp.ravel(targets)
    # Pallas blocks don't like bool refs; everything else is cast in-kernel.
    if x.dtype == jnp.bool_:
        x = x.astype(jnp.float32)
    if t.dtype == jnp.bool_:
        t = t.astype(jnp.float32)
    n = x.shape[0]

    sub = max(_sublane_multiple(x.dtype), _sublane_multiple(t.dtype))
    min_elems = sub * LANES

    # Only pad (i.e. copy) when the flat size is not lane-aligned or too small
    # for one sublane tile; typical segmentation shapes need no copy at all.
    if n % LANES != 0 or n < min_elems:
        n_pad = max(_round_up(n, LANES), min_elems)
        x = jnp.pad(x, (0, n_pad - n))
        t = jnp.pad(t, (0, n_pad - n))
    else:
        n_pad = n

    rows = n_pad // LANES
    block_rows = min(MAX_BLOCK_ROWS, (rows // sub) * sub)
    grid = (pl.cdiv(rows, block_rows),)

    x2 = x.reshape(rows, LANES)   # free reshape, lane-dense [rows, 128] view
    t2 = t.reshape(rows, LANES)

    kernel = functools.partial(_iou_kernel, smooth=float(smooth), n_valid=n)

    # TODO(synk): on v7x, split rows across both TensorCores (leading
    # "parallel" grid axis with per-core partial outputs) for up to ~2x.
    out = pl.pallas_call(
        kernel,
        out_shape=jax.ShapeDtypeStruct((1, 1), jnp.float32),
        grid_spec=pltpu.PrefetchScalarGridSpec(
            num_scalar_prefetch=0,
            grid=grid,
            in_specs=[
                pl.BlockSpec((block_rows, LANES), lambda i: (i, 0)),
                pl.BlockSpec((block_rows, LANES), lambda i: (i, 0)),
            ],
            out_specs=pl.BlockSpec(memory_space=pltpu.SMEM),
            scratch_shapes=[
                pltpu.VMEM((block_rows, LANES), jnp.float32),
                pltpu.VMEM((block_rows, LANES), jnp.float32),
            ],
        ),
        compiler_params=pltpu.CompilerParams(
            dimension_semantics=("arbitrary",),
        ),
    )(x2, t2)
    return out[0, 0]


def iou_loss_ref(inputs, targets, smooth: int = 1):
    """Pure-JAX reference matching the PyTorch module."""
    s = jax.nn.sigmoid(inputs.astype(jnp.float32)).ravel()
    t = targets.astype(jnp.float32).ravel()
    intersection = jnp.sum(s * t)
    total = jnp.sum(s + t)
    union = total - intersection
    return 1.0 - (intersection + smooth) / (union + smooth)


if __name__ == "__main__":
    key = jax.random.PRNGKey(0)
    k1, k2 = jax.random.split(key)
    # Typical segmentation shapes: logits and binary targets, NCHW.
    inputs = jax.random.normal(k1, (2, 4, 16, 16), dtype=jnp.float32)
    targets = (jax.random.uniform(k2, (2, 4, 16, 16)) > 0.5).astype(jnp.float32)

    loss = iou_loss(inputs, targets, smooth=1)
    jax.block_until_ready(loss)

    ref = iou_loss_ref(inputs, targets, smooth=1)
    assert jnp.allclose(loss, ref, atol=1e-5, rtol=1e-5), (loss, ref)
    print("KERNEL_OK")
</pallas_src>

<mosaic_0001>
module attributes {stable_mosaic.version = 11 : i64} {
  func.func @_iou_kernel(%arg0: i32, %arg1: memref<16x128xf32, #tpu.memory_space<vmem>>, %arg2: memref<16x128xf32, #tpu.memory_space<vmem>>, %arg3: memref<1x1xf32, #tpu.memory_space<smem>>, %arg4: memref<16x128xf32, #tpu.memory_space<vmem>>, %arg5: memref<16x128xf32, #tpu.memory_space<vmem>>) attributes {dimension_semantics = [#tpu.dimension_semantics<arbitrary>], iteration_bounds = array<i64: 1>, scalar_prefetch = 0 : i64, scratch_operands = 2 : i64, tpu.core_type = #tpu.core_type<tc>, window_params = [{transform_indices = @transform_0, window_bounds = array<i64: 16, 128>}, {transform_indices = @transform_1, window_bounds = array<i64: 16, 128>}, {transform_indices = @transform_2, window_bounds = array<i64: 1, 1>}]} {
    %c0_i32 = arith.constant 0 : i32
    %0 = arith.cmpi eq, %arg0, %c0_i32 : i32
    %1 = arith.extui %0 : i1 to i32
    %c0_i32_0 = arith.constant 0 : i32
    %2 = arith.cmpi ne, %1, %c0_i32_0 : i32
    scf.if %2 {
      %cst_16 = arith.constant 0.000000e+00 : f32
      %35 = vector.broadcast %cst_16 : f32 to vector<16x128xf32>
      %c0_17 = arith.constant 0 : index
      %c0_18 = arith.constant 0 : index
      %36 = vector.load %arg4[%c0_17, %c0_18] : memref<16x128xf32, #tpu.memory_space<vmem>>, vector<16x128xf32>
      tpu.vector_store %arg4[%c0_17, %c0_18], %35 {strides = array<i32>} : memref<16x128xf32, #tpu.memory_space<vmem>>, vector<16x128xf32>,
      %cst_19 = arith.constant 0.000000e+00 : f32
      %37 = vector.broadcast %cst_19 : f32 to vector<16x128xf32>
      %c0_20 = arith.constant 0 : index
      %c0_21 = arith.constant 0 : index
      %38 = vector.load %arg5[%c0_20, %c0_21] : memref<16x128xf32, #tpu.memory_space<vmem>>, vector<16x128xf32>
      tpu.vector_store %arg5[%c0_20, %c0_21], %37 {strides = array<i32>} : memref<16x128xf32, #tpu.memory_space<vmem>>, vector<16x128xf32>,
    } else {
    }
    %3 = tpu.iota {dimensions = array<i32: 0>} : vector<16x128xi32>
    %4 = tpu.iota {dimensions = array<i32: 1>} : vector<16x128xi32>
    %c16_i32 = arith.constant 16 : i32
    %5 = arith.muli %arg0, %c16_i32 : i32
    %6 = vector.broadcast %5 : i32 to vector<16x128xi32>
    %7 = arith.addi %6, %3 : vector<16x128xi32>
    %c128_i32 = arith.constant 128 : i32
    %8 = vector.broadcast %c128_i32 : i32 to vector<16x128xi32>
    %9 = arith.muli %7, %8 : vector<16x128xi32>
    %10 = arith.addi %9, %4 : vector<16x128xi32>
    %c2048_i32 = arith.constant 2048 : i32
    %11 = vector.broadcast %c2048_i32 : i32 to vector<16x128xi32>
    %12 = arith.cmpi slt, %10, %11 : vector<16x128xi32>
    %c0 = arith.constant 0 : index
    %c0_1 = arith.constant 0 : index
    %13 = vector.load %arg1[%c0, %c0_1] : memref<16x128xf32, #tpu.memory_space<vmem>>, vector<16x128xf32>
    %14 = arith.negf %13 : vector<16x128xf32>
    %15 = math.exp %14 : vector<16x128xf32>
    %cst = arith.constant 1.000000e+00 : f32
    %16 = vector.broadcast %cst : f32 to vector<16x128xf32>
    %17 = arith.addf %16, %15 : vector<16x128xf32>
    %18 = arith.divf %16, %17 : vector<16x128xf32>
    %c0_2 = arith.constant 0 : index
    %c0_3 = arith.constant 0 : index
    %19 = vector.load %arg2[%c0_2, %c0_3] : memref<16x128xf32, #tpu.memory_space<vmem>>, vector<16x128xf32>
    %cst_4 = arith.constant 0.000000e+00 : f32
    %20 = vector.broadcast %cst_4 : f32 to vector<16x128xf32>
    %21 = arith.select %12, %18, %20 : vector<16x128xi1>, vector<16x128xf32>
    %cst_5 = arith.constant 0.000000e+00 : f32
    %22 = vector.broadcast %cst_5 : f32 to vector<16x128xf32>
    %23 = arith.select %12, %19, %22 : vector<16x128xi1>, vector<16x128xf32>
    %c0_6 = arith.constant 0 : index
    %c0_7 = arith.constant 0 : index
    %24 = vector.load %arg4[%c0_6, %c0_7] : memref<16x128xf32, #tpu.memory_space<vmem>>, vector<16x128xf32>
    %25 = arith.mulf %21, %23 : vector<16x128xf32>
    %26 = arith.addf %24, %25 : vector<16x128xf32>
    %c0_8 = arith.constant 0 : index
    %c0_9 = arith.constant 0 : index
    %27 = vector.load %arg4[%c0_8, %c0_9] : memref<16x128xf32, #tpu.memory_space<vmem>>, vector<16x128xf32>
    tpu.vector_store %arg4[%c0_8, %c0_9], %26 {strides = array<i32>} : memref<16x128xf32, #tpu.memory_space<vmem>>, vector<16x128xf32>,
    %c0_10 = arith.constant 0 : index
    %c0_11 = arith.constant 0 : index
    %28 = vector.load %arg5[%c0_10, %c0_11] : memref<16x128xf32, #tpu.memory_space<vmem>>, vector<16x128xf32>
    %29 = arith.addf %21, %23 : vector<16x128xf32>
    %30 = arith.addf %28, %29 : vector<16x128xf32>
    %c0_12 = arith.constant 0 : index
    %c0_13 = arith.constant 0 : index
    %31 = vector.load %arg5[%c0_12, %c0_13] : memref<16x128xf32, #tpu.memory_space<vmem>>, vector<16x128xf32>
    tpu.vector_store %arg5[%c0_12, %c0_13], %30 {strides = array<i32>} : memref<16x128xf32, #tpu.memory_space<vmem>>, vector<16x128xf32>,
    %c0_i32_14 = arith.constant 0 : i32
    %32 = arith.cmpi eq, %arg0, %c0_i32_14 : i32
    %33 = arith.extui %32 : i1 to i32
    %c0_i32_15 = arith.constant 0 : i32
    %34 = arith.cmpi ne, %33, %c0_i32_15 : i32
    scf.if %34 {
      %c0_16 = arith.constant 0 : index
      %c0_17 = arith.constant 0 : index
      %35 = vector.load %arg4[%c0_16, %c0_17] : memref<16x128xf32, #tpu.memory_space<vmem>>, vector<16x128xf32>
      %36 = vector.shape_cast %35 : vector<16x128xf32> to vector<1x16x128xf32>
      %cst_18 = arith.constant dense<0.000000e+00> : vector<1xf32>
      %37 = vector.multi_reduction <add>, %36, %cst_18 [1, 2] : vector<1x16x128xf32> to vector<1xf32>
      %38 = vector.shape_cast %37 : vector<1xf32> to vector<1x1x1xf32>
      %39 = vector.extract %38[0, 0, 0] : f32 from vector<1x1x1xf32>
      %c0_19 = arith.constant 0 : index
      %c0_20 = arith.constant 0 : index
      %40 = vector.load %arg5[%c0_19, %c0_20] : memref<16x128xf32, #tpu.memory_space<vmem>>, vector<16x128xf32>
      %41 = vector.shape_cast %40 : vector<16x128xf32> to vector<1x16x128xf32>
      %cst_21 = arith.constant dense<0.000000e+00> : vector<1xf32>
      %42 = vector.multi_reduction <add>, %41, %cst_21 [1, 2] : vector<1x16x128xf32> to vector<1xf32>
      %43 = vector.shape_cast %42 : vector<1xf32> to vector<1x1x1xf32>
      %44 = vector.extract %43[0, 0, 0] : f32 from vector<1x1x1xf32>
      %45 = arith.subf %44, %39 : f32
      %cst_22 = arith.constant 1.000000e+00 : f32
      %46 = arith.addf %39, %cst_22 : f32
      %cst_23 = arith.constant 1.000000e+00 : f32
      %47 = arith.addf %45, %cst_23 : f32
      %48 = arith.divf %46, %47 : f32
      %cst_24 = arith.constant 1.000000e+00 : f32
      %49 = arith.subf %cst_24, %48 : f32
      %c0_25 = arith.constant 0 : index
      %c0_26 = arith.constant 0 : index
      %50 = memref.load %arg3[%c0_25, %c0_26] : memref<1x1xf32, #tpu.memory_space<smem>>
      memref.store %49, %arg3[%c0_25, %c0_26] : memref<1x1xf32, #tpu.memory_space<smem>>
    } else {
    }
    return
  }
  func.func @transform_0(%arg0: i32) -> (i32, i32) {
    %c0_i32 = arith.constant 0 : i32
    %c0_i32_0 = arith.constant 0 : i32
    return %arg0, %c0_i32 : i32, i32
  }
  func.func @transform_1(%arg0: i32) -> (i32, i32) {
    %c0_i32 = arith.constant 0 : i32
    %c0_i32_0 = arith.constant 0 : i32
    return %arg0, %c0_i32 : i32, i32
  }
  func.func @transform_2(%arg0: i32) -> (i32, i32) {
    %c0_i32 = arith.constant 0 : i32
    %c0_i32_0 = arith.constant 0 : i32
    %c0_i32_1 = arith.constant 0 : i32
    return %c0_i32, %c0_i32_0 : i32, i32
  }
}

</mosaic_0001>

<bundles_post_ra>
// kernel: tpu_custom_call.1
= control target key start
LH: loop header
LB: loop body
LE: loop exit
PB: predicated region body
PF: predicated region fallthrough
CT: control target
= control target key end

     0   :  { %7 = vsyncpa [#allocation5], 0  ;;  %s290_s0 = inlined_call_operand.hbm [shape: f32[16,128], index: 0, kind: input, shape index: {}]   ;;  %s291_s1 = inlined_call_operand.hbm [shape: f32[16,128], index: 1, kind: input, shape index: {}]   ;;  %s292_s2 = inlined_call_operand.hbm [shape: f32[1,1], index: 2, kind: output, shape index: {}]  }
   0x1   :  { %8 = vsyncpa [#allocation8], 0 }
   0x2   :  { %9 = vsyncpa [#allocation6], 0  ;;  %s234_s9 = smov [#allocation4]   ;;  %s174_s13 = scalar_lea.hbm %s290_s0, 256 }
   0x3   :  { %s15_s10 = sshll.u32 %s234_s9, 4  ;;  %p175_p0 = scmp.ne.s32.totalorder %s290_s0, %s174_s13  ;;  %s16_s10 = int_to_ptr.vmem [resolvable:$true] %s15_s10 }
   0x4   :  { %p178_p1 = scmp.lt.u32.totalorder %s174_s13, %s290_s0 }
   0x6   :  { %p180_p2 = pnand %p178_p1, %p175_p0 }
   0x8   :  { %183 = shalt.err (!%p180_p2)
}
   0x9   :  { %s184_s18 = scalar_lea.vmem %s16_s10, 256  ;;  %p189_p4 = scmp.lt.s32.totalorder %s16_s10, %s16_s10 }
   0xa   :  { %p185_p3 = scmp.ne.s32.totalorder %s16_s10, %s184_s18  ;;  %p190_p5 = scmp.lt.s32.totalorder %s184_s18, %s184_s18 }
   0xc   :  { %p191_p6 = por %p190_p5, %p189_p4 }
   0xe   :  { %p192_p7 = pnand %p191_p6, %p185_p3 }
  0x10   :  { %195 = shalt.err (!%p192_p7)
}
  0x11   :  { %s235_s19 = smov 128   ;;  %s236_s20 = smov 8  }
  0x12   :  { %21 = dma.hbm_to_vmem [thread:$0]  %s290_s0, 256, %s16_s10, [#allocation5], %s235_s19, %s235_s19, %s236_s20  }
  0x13   :  { %s237_s23 = smov [#allocation7]   ;;  %s196_s27 = scalar_lea.hbm %s291_s1, 256 }
  0x14   :  { %s27_s24 = sshll.u32 %s237_s23, 4  ;;  %p197_p8 = scmp.ne.s32.totalorder %s291_s1, %s196_s27  ;;  %s28_s24 = int_to_ptr.vmem [resolvable:$true] %s27_s24 }
  0x15   :  { %p200_p9 = scmp.lt.u32.totalorder %s196_s27, %s291_s1 }
  0x17   :  { %p202_p10 = pnand %p200_p9, %p197_p8 }
  0x19   :  { %205 = shalt.err (!%p202_p10)
}
  0x1a   :  { %s206_s4 = scalar_lea.vmem %s28_s24, 256  ;;  %p211_p12 = scmp.lt.s32.totalorder %s28_s24, %s28_s24 }
  0x1b   :  { %p207_p11 = scmp.ne.s32.totalorder %s28_s24, %s206_s4  ;;  %p212_p13 = scmp.lt.s32.totalorder %s206_s4, %s206_s4 }
  0x1d   :  { %p213_p0 = por %p212_p13, %p211_p12 }
  0x1f   :  { %p214_p1 = pnand %p213_p0, %p207_p11 }
  0x21   :  { %217 = shalt.err (!%p214_p1)
}
  0x22   :  { %33 = dma.hbm_to_vmem [thread:$0]  %s291_s1, 256, %s28_s24, [#allocation8], %s235_s19, %s235_s19, %s236_s20  }
  0x23   :  { %228 = dma.done.wait [#allocation5], 256  }
  0x24   :  { %229 = vsyncadd [#allocation5], 4294967040 }
  0x25   :  { %230 = dma.done.wait [#allocation8], 256  }
  0x26   :  { %231 = vsyncadd [#allocation8], 4294967040  ;;  %v63_v0 = vld [vmem:[#allocation4] sm:$0xff]  ;;  %v64_v1 = vld [vmem:[#allocation4 + $0x8] sm:$0xff]  ;;  %v48_v4 = vlaneseq  ;;  %s218_s15 = scalar_lea.hbm %s292_s2, 16 }
  0x27   :  { %v151_v2 = vmul.f32 -1.442695, %v63_v0  ;;  %v152_v3 = vmul.f32 -1.442695, %v64_v1  ;;  %v77_v16 = vld [vmem:[#allocation7] sm:$0xff]  ;;  %v78_v17 = vld [vmem:[#allocation7 + $0x8] sm:$0xff]  ;;  %p219_p2 = scmp.ne.s32.totalorder %s292_s2, %s218_s15  ;;  %p222_p3 = scmp.lt.u32.totalorder %s218_s15, %s292_s2 }
  0x28   :  { %v49_v5 = vshrl.u32 %v48_v4, 7  ;;  %v52_v9 = vand.u32 127, %v48_v4 }
  0x29   :  { %164 = vpow2.f32 %v151_v2  ;;  %p224_p4 = pnand %p222_p3, %p219_p2 }
  0x2a   :  { %166 = vpow2.f32 %v152_v3  ;;  %v50_v6 = vadd.s32 8, %v49_v5  ;;  %v57_v10 = vmul.u32 128, %v49_v5 }
  0x2c   :  { %v58_v12 = vmul.u32 128, %v50_v6  ;;  %v59_v14 = vadd.s32 %v57_v10, %v52_v9 }
  0x2e   :  { %v60_v15 = vadd.s32 %v58_v12, %v52_v9  ;;  %vm61_vm0 = vcmp.lt.s32.totalorder %v59_v14, 2048 }
  0x2f   :  { %v81_v18 = vsel %vm61_vm0, %v77_v16, 0.0 }
  0x30   :  { %vm62_vm1 = vcmp.lt.s32.totalorder %v60_v15, 2048 }
  0x31   :  { %v82_v20 = vsel %vm62_vm1, %v78_v17, 0.0 }
  0x33   :  { %v165_v7 = vpop.eup %164 }
  0x34   :  { %v167_v8 = vpop.eup %166  ;;  %v71_v11 = vadd.f32 1.0, %v165_v7 }
  0x35   :  { %v72_v13 = vadd.f32 1.0, %v167_v8 }
  0x36   :  { %168 = vrcp.f32 %v71_v11 }
  0x37   :  { %170 = vrcp.f32 %v72_v13 }
  0x40   :  { %v169_v19 = vpop.eup %168 }
  0x41   :  { %v171_v21 = vpop.eup %170  ;;  %v79_v22 = vsel %vm61_vm0, %v169_v19, 0.0 }
  0x42   :  { %v80_v23 = vsel %vm62_vm1, %v171_v21, 0.0  ;;  %v85_v24 = vmul.f32 %v81_v18, %v79_v22  ;;  %v93_v26 = vadd.f32 %v81_v18, %v79_v22 }
  0x43   :  { %v86_v25 = vmul.f32 %v82_v20, %v80_v23  ;;  %v94_v27 = vadd.f32 %v82_v20, %v80_v23 }
  0x45   :  { %v104_v28 = vadd.f32 %v86_v25, %v85_v24  ;;  %v116_v29 = vadd.f32 %v94_v27, %v93_v26 }
  0x47   :  { %105 = vadd.xlane.f32.xlu0 %v104_v28 }
  0x4b   :  { %117 = vadd.xlane.f32.xlu0 %v116_v29 }
  0xd4   :  { %v106_v30 = vpop.xlane.xlu0 %105 }
  0xd5   :  { %v107_v31 = vrot.slane %v106_v30, 4 }
  0xd7   :  { %v108_v32 = vadd.f32 %v107_v31, %v106_v30 }
  0xd8   :  { %v118_v33 = vpop.xlane.xlu0 %117 }
  0xd9   :  { %v109_v34 = vrot.slane %v108_v32, 2  ;;  %v119_v35 = vrot.slane %v118_v33, 4 }
  0xdb   :  { %v120_v36 = vadd.f32 %v119_v35, %v118_v33  ;;  %v110_v37 = vadd.f32 %v109_v34, %v108_v32 }
  0xdd   :  { %v121_v38 = vrot.slane %v120_v36, 2  ;;  %v111_v39 = vrot.slane %v110_v37, 1 }
  0xdf   :  { %v122_v40 = vadd.f32 %v121_v38, %v120_v36  ;;  %v112_v41 = vadd.f32 %v111_v39, %v110_v37 }
  0xe1   :  { %153 = vpush %v112_v41  ;;  %v123_v42 = vrot.slane %v122_v40, 1 }
  0xe3   :  { %v124_v43 = vadd.f32 %v123_v42, %v122_v40 }
  0xe5   :  { %155 = vpush %v124_v43 }
 0x112   :  { %s154_s1 = spop %153 }
 0x113   :  { %s127_s9 = sadd.f32 1.0, %s154_s1 }
 0x116   :  { %s156_s6 = spop %155 }
 0x117   :  { %s126_s7 = ssub.f32 %s156_s6, %s154_s1 }
 0x119   :  { %s128_s8 = sadd.f32 1.0, %s126_s7 }
 0x11b   :  { %v129_v44 = vstv %s128_s8 }
 0x11c   :  { %172 = vrcp.f32 %v129_v44 }
 0x126   :  { %v173_v45 = vpop.eup %172 }
 0x127   :  { %157 = vpush %v173_v45 }
 0x158   :  { %s158_s10 = spop %157 }
 0x159   :  { %s132_s11 = smul.f32 %s158_s10, %s127_s9 }
 0x15b   :  { %s133_s12 = ssub.f32 1.0, %s132_s11 }
 0x15d   :  { %135 = sst [smem:[#allocation9]] %s133_s12 }
 0x15e   :  { %227 = shalt.err (!%p224_p4)
}
 0x15f   :  { %s238_s20 = smov [#allocation9]  }
 0x160   :  { %143 = dma.smem_to_hbm %s238_s20, 16, %s292_s2, [#allocation6]  }
 0x161   :  { %232 = dma.done.wait [#allocation6], 16  }
 0x162   :  { %233 = vsyncadd [#allocation6], 4294967280 }
 0x163   :  { %147 = sfence }
 0x164   :  { %148 = vsyncpa [#allocation5], 1 }
 0x165   :  { %149 = vsyncpa [#allocation8], 1 }
 0x166   :  { %150 = vsyncpa [#allocation6], 1 }

</bundles_post_ra>
